<compile_context>
chip_gen: v7x
topology: tpu7x:2x2x1
jax: 0.10.0
libtpu: 0.0.40
codegen_flags: <defaults>
</compile_context>

<pallas_src>
import jax
import jax.numpy as jnp
from jax.experimental import pallas as pl
from jax.experimental.pallas import tpu as pltpu


def _conv1x1_kernel(x_ref, w_ref, b_ref, o_ref):
    # x_ref: (BN, Cin, tm), w_ref: (Cout, Cin), b_ref: (Cout, 1) f32,
    # o_ref: (BN, Cout, tm)
    bn = x_ref.shape[0]
    w = w_ref[...]
    b = b_ref[...]
    if bn == 1:
        acc = jnp.dot(w, x_ref[0], preferred_element_type=jnp.float32)
        o_ref[0] = (acc + b).astype(o_ref.dtype)
    else:
        # Batched matmul: broadcast the (tiny) weight so the fold dimension
        # maps to a dot_general batch dim -- no in-kernel transposes.
        w_b = jnp.broadcast_to(w, (bn,) + w.shape)
        acc = jax.lax.dot_general(
            w_b, x_ref[...],
            dimension_numbers=(((2,), (1,)), ((0,), (0,))),
            preferred_element_type=jnp.float32)
        o_ref[...] = (acc + b[None]).astype(o_ref.dtype)


def _round_up(x, m):
    return ((x + m - 1) // m) * m


def _cdiv(a, b):
    return -(-a // b)


def _vmem_budgets():
    """(tiling budget, compiler vmem limit) derived from this chip's VMEM."""
    cap = 64 * 1024 * 1024  # conservative fallback = v7x per-TC VMEM
    try:
        info_cap = int(getattr(pltpu.get_tpu_info(), "vmem_capacity_bytes", 0))
        if info_cap > 0:
            cap = info_cap
    except Exception:
        pass
    budget = int(0.40 * cap)  # bytes allowed for the double-buffered blocks
    limit = max(32 * 1024 * 1024, min(int(0.75 * cap), 128 * 1024 * 1024))
    return budget, limit


@jax.jit
def channel_reduction_encoder(feat, weight, bias):
    """1x1 conv (ChannelReductionEncoder.forward).

    feat:   (N, Cin, H, W)  NCHW (PyTorch convention), f32 or bf16
    weight: (Cout, Cin)     -- nn.Conv2d weight of shape (Cout, Cin, 1, 1), squeezed
    bias:   (Cout,)
    returns (N, Cout, H, W) in feat.dtype
    """
    N, Cin, H, W = feat.shape
    Cout = weight.shape[0]
    HW = H * W

    x = feat.reshape(N, Cin, HW)              # free reshape; stays in NCHW order
    b2 = bias.astype(jnp.float32).reshape(Cout, 1)

    itemsize = jnp.dtype(feat.dtype).itemsize
    w_itemsize = jnp.dtype(weight.dtype).itemsize
    hw_pad = _round_up(HW, 128)
    vmem_budget, vmem_limit = _vmem_budgets()

    def blocks_bytes(bn, t):
        # double-buffered x/out blocks + (double-buffered) weight & bias blocks
        io = 2 * bn * t * (Cin + Cout) * itemsize
        wb = 2 * (Cout * Cin * w_itemsize + Cout * 4)
        return io + wb

    # Lane tile: largest multiple of 128 that fits the budget, capped by HW.
    tm = (vmem_budget // (2 * (Cin + Cout) * itemsize)) // 128 * 128
    tm = max(128, min(hw_pad, tm))
    while tm > 128 and blocks_bytes(1, tm) > vmem_budget:
        tm -= 128

    # Small feature maps: fold several batch images into one grid step to
    # amortize per-step overhead (keep >= 2 batch blocks for megacore).
    BN = 1
    if tm >= hw_pad and N > 1:
        tm = hw_pad
        bn_fit = max(1, vmem_budget // (2 * hw_pad * (Cin + Cout) * itemsize))
        BN = max(1, min(N, bn_fit, 16, N // 2))
        while BN > 1 and blocks_bytes(BN, tm) > vmem_budget:
            BN -= 1

    # Make sure v7x's two TensorCores both get work when a split is possible.
    if _cdiv(N, BN) * _cdiv(HW, tm) < 2 and tm > 128:
        tm = _round_up(tm // 2, 128)

    grid = (_cdiv(N, BN), _cdiv(HW, tm))

    cost = pl.CostEstimate(
        flops=2 * N * HW * Cin * Cout,
        transcendentals=0,
        bytes_accessed=(N * HW * (Cin + Cout)) * itemsize
        + Cout * Cin * w_itemsize + Cout * 4,
    )

    out = pl.pallas_call(
        _conv1x1_kernel,
        out_shape=jax.ShapeDtypeStruct((N, Cout, HW), feat.dtype),
        grid_spec=pltpu.PrefetchScalarGridSpec(
            num_scalar_prefetch=0,
            grid=grid,
            in_specs=[
                pl.BlockSpec((BN, Cin, tm), lambda b, t: (b, 0, t)),
                pl.BlockSpec((Cout, Cin), lambda b, t: (0, 0)),
                pl.BlockSpec((Cout, 1), lambda b, t: (0, 0)),
            ],
            out_specs=pl.BlockSpec((BN, Cout, tm), lambda b, t: (b, 0, t)),
        ),
        compiler_params=pltpu.CompilerParams(
            dimension_semantics=("parallel", "parallel"),
            vmem_limit_bytes=vmem_limit,
        ),
        cost_estimate=cost,
    )(x, weight, b2)

    return out.reshape(N, Cout, H, W)


def init_params(key, in_channels, out_channels, dtype=jnp.float32):
    """Deterministic init mirroring nn.Conv2d defaults (kaiming-uniform-ish)."""
    kw, kb = jax.random.split(key)
    bound = 1.0 / jnp.sqrt(in_channels)  # kernel_size = 1 -> fan_in = Cin
    weight = jax.random.uniform(kw, (out_channels, in_channels),
                                minval=-bound, maxval=bound, dtype=dtype)
    bias = jax.random.uniform(kb, (out_channels,),
                              minval=-bound, maxval=bound, dtype=dtype)
    return weight, bias


def _reference(feat, weight, bias):
    return (jnp.einsum("nchw,oc->nohw",
                       feat.astype(jnp.float32), weight.astype(jnp.float32))
            + bias.astype(jnp.float32)[None, :, None, None])


if __name__ == "__main__":
    key = jax.random.PRNGKey(0)
    k_x, k_p, k_x2, k_x3 = jax.random.split(key, 4)

    # Small shapes consistent with the module's forward (NCHW channel reduction).
    N, Cin, H, W = 2, 32, 16, 16
    Cout = 8

    feat = jax.random.normal(k_x, (N, Cin, H, W), dtype=jnp.float32)
    weight, bias = init_params(k_p, Cin, Cout)

    out = jax.block_until_ready(channel_reduction_encoder(feat, weight, bias))
    ref = _reference(feat, weight, bias)
    assert out.shape == (N, Cout, H, W)
    assert jnp.allclose(out, ref, atol=1e-5, rtol=1e-5)

    # Ragged spatial extent (H*W not a multiple of 128): cdiv grid + masked edge.
    feat2 = jax.random.normal(k_x2, (1, Cin, 10, 12), dtype=jnp.float32)
    out2 = jax.block_until_ready(channel_reduction_encoder(feat2, weight, bias))
    ref2 = _reference(feat2, weight, bias)
    assert out2.shape == (1, Cout, 10, 12)
    assert jnp.allclose(out2, ref2, atol=1e-5, rtol=1e-5)

    # Larger batch with a small feature map: exercises the batch-fold (BN > 1)
    # batched-dot path that amortizes per-grid-step overhead.
    feat3 = jax.random.normal(k_x3, (8, Cin, H, W), dtype=jnp.float32)
    out3 = jax.block_until_ready(channel_reduction_encoder(feat3, weight, bias))
    ref3 = _reference(feat3, weight, bias)
    assert out3.shape == (8, Cout, H, W)
    assert jnp.allclose(out3, ref3, atol=1e-5, rtol=1e-5)

    # bf16 I/O path (halves HBM traffic); accumulation stays f32 in-kernel.
    feat_bf, w_bf = feat3.astype(jnp.bfloat16), weight.astype(jnp.bfloat16)
    out_bf = jax.block_until_ready(channel_reduction_encoder(feat_bf, w_bf, bias))
    ref_bf = _reference(feat_bf, w_bf, bias)
    assert out_bf.dtype == jnp.bfloat16
    assert jnp.allclose(out_bf.astype(jnp.float32), ref_bf, atol=2e-2, rtol=2e-2)

    print("KERNEL_OK")
</pallas_src>

<mosaic_0001>
module attributes {stable_mosaic.version = 11 : i64} {
  func.func @_conv1x1_kernel(%arg0: i32, %arg1: i32, %arg2: memref<1x32x256xf32, #tpu.memory_space<vmem>>, %arg3: memref<8x32xf32, #tpu.memory_space<vmem>>, %arg4: memref<8x1xf32, #tpu.memory_space<vmem>>, %arg5: memref<1x8x256xf32, #tpu.memory_space<vmem>>) attributes {dimension_semantics = [#tpu.dimension_semantics<parallel>, #tpu.dimension_semantics<parallel>], iteration_bounds = array<i64: 2, 1>, scalar_prefetch = 0 : i64, scratch_operands = 0 : i64, tpu.core_type = #tpu.core_type<tc>, window_params = [{transform_indices = @transform_0, window_bounds = array<i64: 1, 32, 256>}, {pipeline_mode = #tpu.pipeline_mode<synchronous>, transform_indices = @transform_1, window_bounds = array<i64: 8, 32>}, {pipeline_mode = #tpu.pipeline_mode<synchronous>, transform_indices = @transform_2, window_bounds = array<i64: 8, 1>}, {transform_indices = @transform_3, window_bounds = array<i64: 1, 8, 256>}]} {
    %c0 = arith.constant 0 : index
    %c0_0 = arith.constant 0 : index
    %0 = vector.load %arg3[%c0, %c0_0] : memref<8x32xf32, #tpu.memory_space<vmem>>, vector<8x32xf32>
    %c0_1 = arith.constant 0 : index
    %c0_2 = arith.constant 0 : index
    %1 = vector.load %arg4[%c0_1, %c0_2] : memref<8x1xf32, #tpu.memory_space<vmem>>, vector<8x1xf32>
    %c0_3 = arith.constant 0 : index
    %c0_4 = arith.constant 0 : index
    %c0_5 = arith.constant 0 : index
    %2 = vector.load %arg2[%c0_3, %c0_4, %c0_5] : memref<1x32x256xf32, #tpu.memory_space<vmem>>, vector<1x32x256xf32>
    %3 = vector.shape_cast %2 : vector<1x32x256xf32> to vector<32x256xf32>
    %cst = arith.constant dense<0.000000e+00> : vector<8x256xf32>
    %4 = tpu.matmul %0, %3, %cst {dimension_numbers = #tpu.dot_dimension_numbers<[1], [0], [0], [1], [0, 0, 1, 1], [], []>} : vector<8x32xf32>, vector<32x256xf32>, vector<8x256xf32> -> vector<8x256xf32>
    %5 = vector.broadcast %1 : vector<8x1xf32> to vector<8x256xf32>
    %6 = arith.addf %4, %5 : vector<8x256xf32>
    %c0_6 = arith.constant 0 : index
    %c0_7 = arith.constant 0 : index
    %c0_8 = arith.constant 0 : index
    %7 = vector.load %arg5[%c0_6, %c0_7, %c0_8] : memref<1x8x256xf32, #tpu.memory_space<vmem>>, vector<1x8x256xf32>
    %8 = vector.shape_cast %7 : vector<1x8x256xf32> to vector<8x256xf32>
    %9 = vector.shape_cast %6 : vector<8x256xf32> to vector<1x8x256xf32>
    tpu.vector_store %arg5[%c0_6, %c0_7, %c0_8], %9 {strides = array<i32>} : memref<1x8x256xf32, #tpu.memory_space<vmem>>, vector<1x8x256xf32>,
    return
  }
  func.func @transform_0(%arg0: i32, %arg1: i32) -> (i32, i32, i32) {
    %c0_i32 = arith.constant 0 : i32
    %c0_i32_0 = arith.constant 0 : i32
    return %arg0, %c0_i32, %arg1 : i32, i32, i32
  }
  func.func @transform_1(%arg0: i32, %arg1: i32) -> (i32, i32) {
    %c0_i32 = arith.constant 0 : i32
    %c0_i32_0 = arith.constant 0 : i32
    %c0_i32_1 = arith.constant 0 : i32
    return %c0_i32, %c0_i32_0 : i32, i32
  }
  func.func @transform_2(%arg0: i32, %arg1: i32) -> (i32, i32) {
    %c0_i32 = arith.constant 0 : i32
    %c0_i32_0 = arith.constant 0 : i32
    %c0_i32_1 = arith.constant 0 : i32
    return %c0_i32, %c0_i32_0 : i32, i32
  }
  func.func @transform_3(%arg0: i32, %arg1: i32) -> (i32, i32, i32) {
    %c0_i32 = arith.constant 0 : i32
    %c0_i32_0 = arith.constant 0 : i32
    return %arg0, %c0_i32, %arg1 : i32, i32, i32
  }
}

</mosaic_0001>

<bundles_post_ra>
// kernel: channel_reduction_encoder.1
= control target key start
LH: loop header
LB: loop body
LE: loop exit
PB: predicated region body
PF: predicated region fallthrough
CT: control target
= control target key end

     0   :  { %s484_s12 = smov 0   ;;  %s486_s13 = smov 0   ;;  %s523_s0 = inlined_call_operand.vmem [shape: f32[2,32,256], index: 0, kind: input, shape index: {}]   ;;  %s524_s1 = inlined_call_operand.vmem [shape: f32[8,32], index: 1, kind: input, shape index: {}]   ;;  %s525_s2 = inlined_call_operand.vmem [shape: f32[8,1], index: 2, kind: input, shape index: {}]   ;;  %s526_s3 = inlined_call_operand.vmem [shape: f32[2,8,256], index: 3, kind: output, shape index: {}]  }
   0x1   :  { %s488_s14 = smov 0  }
   0x2 LB: > { %s25_s15 = sadd.s32 1, %s456_s13  ;;  %p393_p0 = scmp.ge.s32.totalorder %s460_s14, 1  ;;  %s460_s14 = sphi %s488_s14, %s13_s14   ;;  %s456_s13 = sphi %s486_s13, %s528_s13   ;;  %s452_s12 = sphi %s484_s12, %s527_s12  }
   0x3   : > { %p27_p1 = scmp.ge.s32.totalorder %s25_s15, 2  ;;  %p158_p2 = scmp.lt.s32.totalorder %s460_s14, 3 }
   0x5   : > { %s530_s15 = smov (%p27_p1, %s25_s15), 0  ;;  %p159_p3 = pnand %p393_p0, %p158_p2 }
   0x6   : > { %p191_p4 = scmp.lt.s32.totalorder (!%p159_p3), %s452_s12, 1  ;;  %v211_v0 = vld [vmem:[%s525_s2] sm:$0xff] (!%p159_p3)  ;;  %v462_v1 = vmov (!%p159_p3), 0.0   ;;  %v463_v2 = vmov (!%p159_p3), 0   ;;  %vm225_vm0 = vcmask (!%p159_p3), 261120  }
   0x7   : > { %162 = sbr.rel (%p159_p3) target bundleno = 244 (0xf4), region = 32  ;;  %293 = vmatprep.mubr.f32.mxu0 (!%p159_p3), %v462_v1  ;;  %437 = vset.pattern.permute.xlu0 (!%p159_p3), %v463_v2  ;;  %v210_v15 = vld [vmem:[%s524_s1] sm:$0xff] (!%p159_p3) }
   0x8   : > { %222 = vperm.xlu0 (!%p159_p3), %437, %v211_v0  }
   0xe   : > { %s532_s12 = smov (!%p191_p4, %s452_s12), 1 }
   0xf   : > { %s401_s18 = sshll.u32 %s532_s12, 6  ;;  %s402_s24 = sshll.u32 %s532_s12, 4 }
  0x10   : > { %s198_s21 = scalar_lea.vmem %s523_s0, %s401_s18  ;;  %s208_s27 = scalar_lea.vmem %s526_s3, %s402_s24 }
  0x11   : > { %v213_v3 = vld [vmem:[%s198_s21 + $0x8] sm:$0xff]  ;;  %v215_v4 = vld [vmem:[%s198_s21 + $0x18] sm:$0xff]  ;;  %v212_v5 = vld [vmem:[%s198_s21] sm:$0xff] }
  0x12   : > { %v403_v6 = vpack.c.bf16 %v215_v4, %v213_v3  ;;  %v214_v7 = vld [vmem:[%s198_s21 + $0x10] sm:$0xff]  ;;  %v217_v8 = vld [vmem:[%s198_s21 + $0x28] sm:$0xff]  ;;  %v219_v9 = vld [vmem:[%s198_s21 + $0x38] sm:$0xff] }
  0x13   : > { %v405_v10 = vpack.c.bf16 %v214_v7, %v212_v5  ;;  %v407_v11 = vpack.c.bf16 %v219_v9, %v217_v8  ;;  %v216_v12 = vld [vmem:[%s198_s21 + $0x20] sm:$0xff]  ;;  %v218_v13 = vld [vmem:[%s198_s21 + $0x30] sm:$0xff] }
  0x14   : > { %404 = vmatprep.subr.bf16.mxu0 %v403_v6  ;;  %v409_v14 = vpack.c.bf16 %v218_v13, %v216_v12 }
  0x15   : > { %406 = vmatpush1.bf16.msra.mxu0 %v405_v10 }
  0x16   : > { %408 = vmatprep.subr.bf16.mxu0 %v407_v11 }
  0x19   : > { %410 = vmatpush1.bf16.msra.mxu0 %v409_v14 }
  0x1c   : > { %398 = vmatmul.mubr.msk.f32.vlgmr.msra.gmra.mrb[0].mxu0 %vm225_vm0, %v210_v15 }
  0x87   : > { %v223_v16 = vpop.permute.xlu0 %222 }
  0xef   : > { %v295_v17 = vpop.f32.mrb[0].mxu0 }
  0xf0   : > { %v296_v18 = vadd.f32 %v295_v17, %v223_v16  ;;  %v297_v19 = vpop.f32.mrb[1].mxu0 }
  0xf1   : > { %v298_v20 = vadd.f32 %v297_v19, %v223_v16 }
  0xf2   : > { %300 = vst [vmem:[%s208_s27] sm:$0xff] %v296_v18 }
  0xf3   : > { %301 = vst [vmem:[%s208_s27 + $0x8] sm:$0xff] %v298_v20 }
  0xf4 PF: > { %s13_s14 = sadd.s32 1, %s460_s14   ;;  %s527_s12 = smov %s456_s13 }
  0xf5   : > { %p10_p5 = scmp.ge.s32.totalorder %s13_s14, 4   ;;  %s528_s13 = smov %s530_s15 }
  0xf7   :  { %12 = sbr.rel (!%p10_p5) target bundleno = 2 (0x2), region = 62 }

</bundles_post_ra>
